<compile_context>
chip_gen: v6e
topology: v6e:2x2x1
jax: 0.10.0
libtpu: 0.0.40
codegen_flags: <defaults>
</compile_context>

<pallas_src>
import jax
import jax.numpy as jnp
from jax.experimental import pallas as pl
from jax.experimental.pallas import tpu as pltpu


def _gaussian4svi_kernel(mean_ref, log_std_ref, mean_out_ref, log_std_out_ref):
    # Pure pass-through of the two learned parameters (inputs are aliased to
    # the outputs, so this lowers to at most a tile-local VMEM copy).
    mean_out_ref[...] = mean_ref[...]
    log_std_out_ref[...] = log_std_ref[...]


def gaussian4svi_forward(x, mean, log_std):
    """Pallas implementation of Gaussian4SVI.forward.

    Args:
      x:       [batch, dim]  (ignored by the module; NOT DMA'd by the kernel)
      mean:    [batch, dim]  parameter
      log_std: [batch, dim]  parameter
    Returns:
      (mean, log_std) with the same shapes/dtypes as the parameters.
    """
    del x  # unused by the forward (matches the PyTorch module), never copied.

    b, d = mean.shape

    # Tile the batch axis only when it is large; keeps full-extent blocks for
    # small shapes (valid regardless of the (8,128) rule) and bounds VMEM
    # residency for big ones (v5e: 16 MiB scoped default, v7x: 64 MiB total).
    if b > 512 and b % 512 == 0:
        row_block = 512
    else:
        row_block = b
    grid = (b // row_block,)

    spec = pl.BlockSpec((row_block, d), lambda i: (i, 0))

    return pl.pallas_call(
        _gaussian4svi_kernel,
        grid=grid,
        in_specs=[spec, spec],
        out_specs=(spec, spec),
        out_shape=(
            jax.ShapeDtypeStruct((b, d), mean.dtype),
            jax.ShapeDtypeStruct((b, d), log_std.dtype),
        ),
        # mean -> output 0, log_std -> output 1: lets XLA alias the buffers so
        # the "copy" costs (at most) nothing beyond a defensive copy.
        input_output_aliases={0: 0, 1: 1},
        compiler_params=pltpu.CompilerParams(
            dimension_semantics=("parallel",),  # shards across TCs on v7x
        ),
    )(mean, log_std)


if __name__ == "__main__":
    batch_size, dim = 2, 32

    # Deterministic parameter init, matching nn.Parameter(torch.zeros(...)).
    mean = jnp.zeros((batch_size, dim), dtype=jnp.float32)
    log_std = jnp.zeros((batch_size, dim), dtype=jnp.float32)

    # Example input X (ignored by the forward, as in the PyTorch module).
    key = jax.random.PRNGKey(0)
    x = jax.random.normal(key, (batch_size, dim), dtype=jnp.float32)

    out_mean, out_log_std = gaussian4svi_forward(x, mean, log_std)
    jax.block_until_ready((out_mean, out_log_std))

    assert out_mean.shape == (batch_size, dim)
    assert out_log_std.shape == (batch_size, dim)
    assert out_mean.dtype == mean.dtype
    assert out_log_std.dtype == log_std.dtype
    assert bool(jnp.all(out_mean == 0.0))
    assert bool(jnp.all(out_log_std == 0.0))

    print("KERNEL_OK")
</pallas_src>

<mosaic_0001>
module attributes {stable_mosaic.version = 11 : i64} {
  func.func @_gaussian4svi_kernel(%arg0: i32, %arg1: memref<2x32xf32, #tpu.memory_space<vmem>>, %arg2: memref<2x32xf32, #tpu.memory_space<vmem>>, %arg3: memref<2x32xf32, #tpu.memory_space<vmem>>, %arg4: memref<2x32xf32, #tpu.memory_space<vmem>>) attributes {dimension_semantics = [#tpu.dimension_semantics<parallel>], iteration_bounds = array<i64: 1>, scalar_prefetch = 0 : i64, scratch_operands = 0 : i64, tpu.core_type = #tpu.core_type<tc>, window_params = [{transform_indices = @transform_0, window_bounds = array<i64: 2, 32>}, {transform_indices = @transform_1, window_bounds = array<i64: 2, 32>}, {transform_indices = @transform_2, window_bounds = array<i64: 2, 32>}, {transform_indices = @transform_3, window_bounds = array<i64: 2, 32>}]} {
    %c0 = arith.constant 0 : index
    %c0_0 = arith.constant 0 : index
    %0 = vector.load %arg1[%c0, %c0_0] : memref<2x32xf32, #tpu.memory_space<vmem>>, vector<2x32xf32>
    %c0_1 = arith.constant 0 : index
    %c0_2 = arith.constant 0 : index
    %1 = vector.load %arg3[%c0_1, %c0_2] : memref<2x32xf32, #tpu.memory_space<vmem>>, vector<2x32xf32>
    tpu.vector_store %arg3[%c0_1, %c0_2], %0 {strides = array<i32>} : memref<2x32xf32, #tpu.memory_space<vmem>>, vector<2x32xf32>,
    %c0_3 = arith.constant 0 : index
    %c0_4 = arith.constant 0 : index
    %2 = vector.load %arg2[%c0_3, %c0_4] : memref<2x32xf32, #tpu.memory_space<vmem>>, vector<2x32xf32>
    %c0_5 = arith.constant 0 : index
    %c0_6 = arith.constant 0 : index
    %3 = vector.load %arg4[%c0_5, %c0_6] : memref<2x32xf32, #tpu.memory_space<vmem>>, vector<2x32xf32>
    tpu.vector_store %arg4[%c0_5, %c0_6], %2 {strides = array<i32>} : memref<2x32xf32, #tpu.memory_space<vmem>>, vector<2x32xf32>,
    return
  }
  func.func @transform_0(%arg0: i32) -> (i32, i32) {
    %c0_i32 = arith.constant 0 : i32
    %c0_i32_0 = arith.constant 0 : i32
    return %arg0, %c0_i32 : i32, i32
  }
  func.func @transform_1(%arg0: i32) -> (i32, i32) {
    %c0_i32 = arith.constant 0 : i32
    %c0_i32_0 = arith.constant 0 : i32
    return %arg0, %c0_i32 : i32, i32
  }
  func.func @transform_2(%arg0: i32) -> (i32, i32) {
    %c0_i32 = arith.constant 0 : i32
    %c0_i32_0 = arith.constant 0 : i32
    return %arg0, %c0_i32 : i32, i32
  }
  func.func @transform_3(%arg0: i32) -> (i32, i32) {
    %c0_i32 = arith.constant 0 : i32
    %c0_i32_0 = arith.constant 0 : i32
    return %arg0, %c0_i32 : i32, i32
  }
}

</mosaic_0001>

<bundles_post_ra>
// kernel: tpu_custom_call.1
= control target key start
LH: loop header
LB: loop body
LE: loop exit
PB: predicated region body
PF: predicated region fallthrough
CT: control target
= control target key end

     0   :  { %9 = vsyncpa [#allocation3], 0  ;;  %s202_s0 = inlined_call_operand.hbm [shape: f32[2,32], index: 0, kind: input, shape index: {}, may-alias: {0,2}]   ;;  %s203_s1 = inlined_call_operand.hbm [shape: f32[2,32], index: 1, kind: input, shape index: {}, may-alias: {1,3}]   ;;  %s204_s2 = inlined_call_operand.hbm [shape: f32[2,32], index: 2, kind: output, shape index: {0}, may-alias: {0,2}]   ;;  %s205_s3 = inlined_call_operand.hbm [shape: f32[2,32], index: 3, kind: output, shape index: {1}, may-alias: {1,3}]  }
   0x1   :  { %10 = vsyncpa [#allocation6], 0 }
   0x2   :  { %11 = vsyncpa [#allocation4], 0 }
   0x3   :  { %12 = vsyncpa [#allocation9], 0  ;;  %s166_s12 = smov [#allocation2]   ;;  %s167_s14 = smov [#allocation5]  }
   0x4   :  { %s19_s13 = sshll.u32 %s166_s12, 4  ;;  %s29_s15 = sshll.u32 %s167_s14, 4  ;;  %s20_s13 = int_to_ptr.vmem [resolvable:$true] %s19_s13  ;;  %s30_s15 = int_to_ptr.vmem [resolvable:$true] %s29_s15 }
   0x5   :  { %s86_s16 = scalar_lea.vmem %s20_s13, 32  ;;  %p91_p1 = scmp.lt.s32.totalorder %s20_s13, %s20_s13 }
   0x6   :  { %p87_p0 = scmp.ne.s32.totalorder %s20_s13, %s86_s16  ;;  %p92_p2 = scmp.lt.s32.totalorder %s86_s16, %s86_s16 }
   0x8   :  { %p93_p3 = por %p92_p2, %p91_p1 }
   0xa   :  { %p94_p4 = pnand %p93_p3, %p87_p0 }
   0xc   :  { %97 = shalt.err (!%p94_p4)
}
   0xd   :  { %22 = dma.hbm_to_vmem [thread:$0]  %s202_s0, 32, %s20_s13, [#allocation3]  }
   0xe   :  { %s106_s19 = scalar_lea.vmem %s30_s15, 32  ;;  %p111_p6 = scmp.lt.s32.totalorder %s30_s15, %s30_s15 }
   0xf   :  { %p107_p5 = scmp.ne.s32.totalorder %s30_s15, %s106_s19  ;;  %p112_p7 = scmp.lt.s32.totalorder %s106_s19, %s106_s19 }
  0x11   :  { %p113_p8 = por %p112_p7, %p111_p6 }
  0x13   :  { %p114_p9 = pnand %p113_p8, %p107_p5 }
  0x15   :  { %117 = shalt.err (!%p114_p9)
}
  0x16   :  { %32 = dma.hbm_to_vmem [thread:$0]  %s203_s1, 32, %s30_s15, [#allocation6]  }
  0x17   :  { %158 = dma.done.wait [#allocation3], 32  }
  0x18   :  { %159 = vsyncadd [#allocation3], 4294967264 }
  0x19   :  { %160 = dma.done.wait [#allocation6], 32  }
  0x1a   :  { %161 = vsyncadd [#allocation6], 4294967264  ;;  %s168_s22 = smov [#allocation7]   ;;  %s169_s24 = smov [#allocation8]   ;;  %vm40_vm0 = vcmask 254976  }
  0x1b   :  { %s50_s23 = sshll.u32 %s168_s22, 4  ;;  %s60_s25 = sshll.u32 %s169_s24, 4  ;;  %v39_v0 = vld [vmem:[#allocation2] sm:$0x3]  ;;  %v42_v1 = vld [vmem:[#allocation5] sm:$0x3]  ;;  %s51_s23 = int_to_ptr.vmem [resolvable:$true] %s50_s23  ;;  %s61_s25 = int_to_ptr.vmem [resolvable:$true] %s60_s25 }
  0x1c   :  { %41 = vst.msk [vmem:[#allocation7] sm:$0x3] %vm40_vm0, %v39_v0  ;;  %43 = vst.msk [vmem:[#allocation8] sm:$0x3] %vm40_vm0, %v42_v1  ;;  %s118_s0 = scalar_lea.vmem %s51_s23, 32  ;;  %p123_p11 = scmp.lt.s32.totalorder %s51_s23, %s51_s23 }
  0x1d   :  { %p119_p10 = scmp.ne.s32.totalorder %s51_s23, %s118_s0  ;;  %p124_p12 = scmp.lt.s32.totalorder %s118_s0, %s118_s0 }
  0x1f   :  { %p125_p13 = por %p124_p12, %p123_p11 }
  0x21   :  { %p126_p0 = pnand %p125_p13, %p119_p10 }
  0x23   :  { %129 = shalt.err (!%p126_p0)
}
  0x24   :  { %53 = dma.vmem_to_hbm [thread:$0]  %s51_s23, 32, %s204_s2, [#allocation4]  }
  0x25   :  { %s138_s27 = scalar_lea.vmem %s61_s25, 32  ;;  %p143_p2 = scmp.lt.s32.totalorder %s61_s25, %s61_s25 }
  0x26   :  { %p139_p1 = scmp.ne.s32.totalorder %s61_s25, %s138_s27  ;;  %p144_p3 = scmp.lt.s32.totalorder %s138_s27, %s138_s27 }
  0x28   :  { %p145_p4 = por %p144_p3, %p143_p2 }
  0x2a   :  { %p146_p5 = pnand %p145_p4, %p139_p1 }
  0x2c   :  { %149 = shalt.err (!%p146_p5)
}
  0x2d   :  { %63 = dma.vmem_to_hbm [thread:$0]  %s61_s25, 32, %s205_s3, [#allocation9]  }
  0x2e   :  { %162 = dma.done.wait [#allocation4], 32  }
  0x2f   :  { %163 = vsyncadd [#allocation4], 4294967264 }
  0x30   :  { %164 = dma.done.wait [#allocation9], 32  }
  0x31   :  { %165 = vsyncadd [#allocation9], 4294967264 }
  0x32   :  { %70 = vsyncpa [#allocation3], 1 }
  0x33   :  { %71 = vsyncpa [#allocation6], 1 }
  0x34   :  { %72 = vsyncpa [#allocation4], 1 }
  0x35   :  { %73 = vsyncpa [#allocation9], 1 }

</bundles_post_ra>
